<compile_context>
chip_gen: v5e
topology: v5e:2x2
jax: 0.10.0
libtpu: 0.0.40
codegen_flags: <defaults>
</compile_context>

<pallas_src>
import functools

import jax
import jax.numpy as jnp
from jax.experimental import pallas as pl
from jax.experimental.pallas import tpu as pltpu


def _nll_loss_kernel(prob_ref, weight_ref, target_ref, out_ref, acc_ref, *,
                     n_rows, tile_rows):
    """One grid step processes a (TN, C) row-tile of prob.

    prob_ref:   (TN, C) VMEM, native dtype (pipelined over rows)
    weight_ref: (1,  C) f32 VMEM (resident: same block every step)
    target_ref: (TN, 1) i32 VMEM (pipelined over rows)
    out_ref:    (1,  1) f32 SMEM (whole output, written once on last step)
    acc_ref:    (1,  C) f32 VMEM scratch accumulator (persists across steps)
    """
    i = pl.program_id(0)

    @pl.when(i == 0)
    def _init():
        acc_ref[...] = jnp.zeros_like(acc_ref)

    prob = prob_ref[...].astype(jnp.float32)          # (TN, C); upcast in-kernel
    target = target_ref[...]                          # (TN, 1) i32

    # one-hot selection of prob[n, target[n]] via lane-iota compare, plus a row
    # mask so the undefined rows of a ragged last tile contribute exactly 0.
    col_ids = jax.lax.broadcasted_iota(jnp.int32, prob.shape, dimension=1)
    row_ids = jax.lax.broadcasted_iota(jnp.int32, prob.shape, dimension=0)
    valid = (col_ids == target) & ((row_ids + i * tile_rows) < n_rows)
    selected = jnp.where(valid, prob, jnp.float32(0.0))

    # per-step work: just a row-sum into the resident vector accumulator
    acc_ref[...] += jnp.sum(selected, axis=0, keepdims=True)    # (1, C)

    @pl.when(i == pl.num_programs(0) - 1)
    def _finalize():
        # weight multiply + lane reduce + negate happen exactly once
        out_ref[0, 0] = -jnp.sum(acc_ref[...] * weight_ref[...])


def _round_up(x, m):
    return ((x + m - 1) // m) * m


def nll_loss(prob, target, weight, *, vmem_tile_budget_bytes=4 << 20):
    """Pallas implementation of the self-defined NLLLoss (reduction='sum').

    Args:
      prob:   (N, C) float32 or bfloat16 (DMA'd in native dtype)
      target: (N,)   integer class indices in [0, C)
      weight: (C,)   per-class weights
      vmem_tile_budget_bytes: max bytes for ONE prob tile buffer (double-buffered
        by the pipeline).  Default 4 MiB fits the default scoped VMEM on all gens.
    Returns:
      scalar float32 loss = -sum_n weight[target[n]] * prob[n, target[n]]

    Note: out-of-range targets silently contribute 0 (no ignore_index semantics).
    """
    N, C = prob.shape
    weight2d = weight.reshape(1, C).astype(jnp.float32)
    target2d = target.reshape(N, 1).astype(jnp.int32)

    itemsize = jnp.dtype(prob.dtype).itemsize
    # sublane packing: f32 -> 8-row tiles, bf16 -> 16, int8/fp8 -> 32
    sub_mult = 8 * (4 // itemsize)

    # Row-tile size chosen purely by bytes (no arbitrary row cap).
    rows_fit = max(sub_mult, (vmem_tile_budget_bytes // (C * itemsize))
                   // sub_mult * sub_mult)
    tn = min(rows_fit, _round_up(N, sub_mult))
    grid = (pl.cdiv(N, tn),)

    kernel = functools.partial(_nll_loss_kernel, n_rows=N, tile_rows=tn)

    out = pl.pallas_call(
        kernel,
        out_shape=jax.ShapeDtypeStruct((1, 1), jnp.float32),
        grid_spec=pltpu.PrefetchScalarGridSpec(
            num_scalar_prefetch=0,
            grid=grid,
            in_specs=[
                pl.BlockSpec((tn, C), lambda i: (i, 0)),   # prob: tiled over rows
                pl.BlockSpec((1, C), lambda i: (0, 0)),    # weight: resident
                pl.BlockSpec((tn, 1), lambda i: (i, 0)),   # target: tiled over rows
            ],
            out_specs=pl.BlockSpec(memory_space=pltpu.MemorySpace.SMEM),
            scratch_shapes=[pltpu.VMEM((1, C), jnp.float32)],
        ),
        compiler_params=pltpu.CompilerParams(
            dimension_semantics=("arbitrary",),   # reduction axis (resident acc)
        ),
    )(prob, weight2d, target2d)
    return out[0, 0]


def _ref_nll_loss(prob, target, weight):
    n = prob.shape[0]
    p = prob.astype(jnp.float32)
    return -jnp.sum(weight[target] * p[jnp.arange(n), target])


if __name__ == "__main__":
    key = jax.random.PRNGKey(0)
    k_prob, k_tgt, k_w = jax.random.split(key, 3)

    # case 1: small shapes matching the module's (N, C) / (N,) / (C,) signature
    N, C = 8, 16
    prob = jax.random.normal(k_prob, (N, C), dtype=jnp.float32)
    target = jax.random.randint(k_tgt, (N,), 0, C, dtype=jnp.int32)
    weight = jax.random.uniform(k_w, (C,), dtype=jnp.float32)

    loss = nll_loss(prob, target, weight)
    jax.block_until_ready(loss)
    ref = _ref_nll_loss(prob, target, weight)
    assert jnp.allclose(loss, ref, rtol=1e-5, atol=1e-5), (loss, ref)

    # case 2: force multi-tile + ragged-last-tile masking (TN=16, 3 grid steps,
    # last tile has 4 out-of-bounds rows masked in-kernel; no wrapper padding)
    N2, C2 = 44, 128
    prob2 = jax.random.normal(k_prob, (N2, C2), dtype=jnp.float32)
    target2 = jax.random.randint(k_tgt, (N2,), 0, C2, dtype=jnp.int32)
    weight2 = jax.random.uniform(k_w, (C2,), dtype=jnp.float32)
    loss2 = nll_loss(prob2, target2, weight2,
                     vmem_tile_budget_bytes=16 * C2 * 4)
    jax.block_until_ready(loss2)
    ref2 = _ref_nll_loss(prob2, target2, weight2)
    assert jnp.allclose(loss2, ref2, rtol=1e-5, atol=1e-4), (loss2, ref2)

    # case 3: bf16 prob DMA'd natively (half the HBM read bytes), upcast in-kernel
    N3, C3 = 40, 256
    prob3 = jax.random.normal(k_prob, (N3, C3), dtype=jnp.bfloat16)
    target3 = jax.random.randint(k_tgt, (N3,), 0, C3, dtype=jnp.int32)
    weight3 = jax.random.uniform(k_w, (C3,), dtype=jnp.float32)
    loss3 = nll_loss(prob3, target3, weight3)
    jax.block_until_ready(loss3)
    ref3 = _ref_nll_loss(prob3, target3, weight3)
    assert jnp.allclose(loss3, ref3, rtol=1e-5, atol=1e-3), (loss3, ref3)

    print("KERNEL_OK")
</pallas_src>

<mosaic_0001>
module attributes {stable_mosaic.version = 11 : i64} {
  func.func @_nll_loss_kernel(%arg0: i32, %arg1: memref<8x16xf32, #tpu.memory_space<vmem>>, %arg2: memref<1x16xf32, #tpu.memory_space<vmem>>, %arg3: memref<8x1xi32, #tpu.memory_space<vmem>>, %arg4: memref<1x1xf32, #tpu.memory_space<smem>>, %arg5: memref<1x16xf32, #tpu.memory_space<vmem>>) attributes {dimension_semantics = [#tpu.dimension_semantics<arbitrary>], iteration_bounds = array<i64: 1>, scalar_prefetch = 0 : i64, scratch_operands = 1 : i64, tpu.core_type = #tpu.core_type<tc>, window_params = [{transform_indices = @transform_0, window_bounds = array<i64: 8, 16>}, {pipeline_mode = #tpu.pipeline_mode<synchronous>, transform_indices = @transform_1, window_bounds = array<i64: 1, 16>}, {transform_indices = @transform_2, window_bounds = array<i64: 8, 1>}, {transform_indices = @transform_3, window_bounds = array<i64: 1, 1>}]} {
    %c0_i32 = arith.constant 0 : i32
    %0 = arith.cmpi eq, %arg0, %c0_i32 : i32
    %1 = arith.extui %0 : i1 to i32
    %c0_i32_0 = arith.constant 0 : i32
    %2 = arith.cmpi ne, %1, %c0_i32_0 : i32
    scf.if %2 {
      %cst_12 = arith.constant 0.000000e+00 : f32
      %25 = vector.broadcast %cst_12 : f32 to vector<1x16xf32>
      %c0_13 = arith.constant 0 : index
      %c0_14 = arith.constant 0 : index
      %26 = vector.load %arg5[%c0_13, %c0_14] : memref<1x16xf32, #tpu.memory_space<vmem>>, vector<1x16xf32>
      tpu.vector_store %arg5[%c0_13, %c0_14], %25 {strides = array<i32>} : memref<1x16xf32, #tpu.memory_space<vmem>>, vector<1x16xf32>,
    } else {
    }
    %c0 = arith.constant 0 : index
    %c0_1 = arith.constant 0 : index
    %3 = vector.load %arg1[%c0, %c0_1] : memref<8x16xf32, #tpu.memory_space<vmem>>, vector<8x16xf32>
    %c0_2 = arith.constant 0 : index
    %c0_3 = arith.constant 0 : index
    %4 = vector.load %arg3[%c0_2, %c0_3] : memref<8x1xi32, #tpu.memory_space<vmem>>, vector<8x1xi32>
    %5 = tpu.iota {dimensions = array<i32: 1>} : vector<8x16xi32>
    %6 = tpu.iota {dimensions = array<i32: 0>} : vector<8x16xi32>
    %7 = vector.broadcast %4 : vector<8x1xi32> to vector<8x16xi32>
    %8 = arith.cmpi eq, %5, %7 : vector<8x16xi32>
    %c8_i32 = arith.constant 8 : i32
    %9 = arith.muli %arg0, %c8_i32 : i32
    %10 = vector.broadcast %9 : i32 to vector<8x16xi32>
    %11 = arith.addi %6, %10 : vector<8x16xi32>
    %c8_i32_4 = arith.constant 8 : i32
    %12 = vector.broadcast %c8_i32_4 : i32 to vector<8x16xi32>
    %13 = arith.cmpi slt, %11, %12 : vector<8x16xi32>
    %14 = arith.andi %8, %13 : vector<8x16xi1>
    %cst = arith.constant 0.000000e+00 : f32
    %15 = vector.broadcast %cst : f32 to vector<8x16xf32>
    %16 = arith.select %14, %3, %15 : vector<8x16xi1>, vector<8x16xf32>
    %c0_5 = arith.constant 0 : index
    %c0_6 = arith.constant 0 : index
    %17 = vector.load %arg5[%c0_5, %c0_6] : memref<1x16xf32, #tpu.memory_space<vmem>>, vector<1x16xf32>
    %cst_7 = arith.constant dense<0.000000e+00> : vector<16xf32>
    %18 = vector.multi_reduction <add>, %16, %cst_7 [0] : vector<8x16xf32> to vector<16xf32>
    %19 = vector.shape_cast %18 : vector<16xf32> to vector<1x16xf32>
    %20 = arith.addf %17, %19 : vector<1x16xf32>
    %c0_8 = arith.constant 0 : index
    %c0_9 = arith.constant 0 : index
    %21 = vector.load %arg5[%c0_8, %c0_9] : memref<1x16xf32, #tpu.memory_space<vmem>>, vector<1x16xf32>
    tpu.vector_store %arg5[%c0_8, %c0_9], %20 {strides = array<i32>} : memref<1x16xf32, #tpu.memory_space<vmem>>, vector<1x16xf32>,
    %c0_i32_10 = arith.constant 0 : i32
    %22 = arith.cmpi eq, %arg0, %c0_i32_10 : i32
    %23 = arith.extui %22 : i1 to i32
    %c0_i32_11 = arith.constant 0 : i32
    %24 = arith.cmpi ne, %23, %c0_i32_11 : i32
    scf.if %24 {
      %c0_12 = arith.constant 0 : index
      %c0_13 = arith.constant 0 : index
      %25 = vector.load %arg5[%c0_12, %c0_13] : memref<1x16xf32, #tpu.memory_space<vmem>>, vector<1x16xf32>
      %c0_14 = arith.constant 0 : index
      %c0_15 = arith.constant 0 : index
      %26 = vector.load %arg2[%c0_14, %c0_15] : memref<1x16xf32, #tpu.memory_space<vmem>>, vector<1x16xf32>
      %27 = arith.mulf %25, %26 : vector<1x16xf32>
      %28 = vector.shape_cast %27 : vector<1x16xf32> to vector<1x1x16xf32>
      %cst_16 = arith.constant dense<0.000000e+00> : vector<1xf32>
      %29 = vector.multi_reduction <add>, %28, %cst_16 [1, 2] : vector<1x1x16xf32> to vector<1xf32>
      %30 = vector.shape_cast %29 : vector<1xf32> to vector<1x1x1xf32>
      %31 = vector.extract %30[0, 0, 0] : f32 from vector<1x1x1xf32>
      %cst_17 = arith.constant 0.000000e+00 : f32
      %32 = arith.subf %cst_17, %31 : f32
      %c0_18 = arith.constant 0 : index
      %c0_19 = arith.constant 0 : index
      %33 = memref.load %arg4[%c0_18, %c0_19] : memref<1x1xf32, #tpu.memory_space<smem>>
      memref.store %32, %arg4[%c0_18, %c0_19] : memref<1x1xf32, #tpu.memory_space<smem>>
    } else {
    }
    return
  }
  func.func @transform_0(%arg0: i32) -> (i32, i32) {
    %c0_i32 = arith.constant 0 : i32
    %c0_i32_0 = arith.constant 0 : i32
    return %arg0, %c0_i32 : i32, i32
  }
  func.func @transform_1(%arg0: i32) -> (i32, i32) {
    %c0_i32 = arith.constant 0 : i32
    %c0_i32_0 = arith.constant 0 : i32
    %c0_i32_1 = arith.constant 0 : i32
    return %c0_i32, %c0_i32_0 : i32, i32
  }
  func.func @transform_2(%arg0: i32) -> (i32, i32) {
    %c0_i32 = arith.constant 0 : i32
    %c0_i32_0 = arith.constant 0 : i32
    return %arg0, %c0_i32 : i32, i32
  }
  func.func @transform_3(%arg0: i32) -> (i32, i32) {
    %c0_i32 = arith.constant 0 : i32
    %c0_i32_0 = arith.constant 0 : i32
    %c0_i32_1 = arith.constant 0 : i32
    return %c0_i32, %c0_i32_0 : i32, i32
  }
}

</mosaic_0001>

<bundles_post_ra>
// kernel: tpu_custom_call.1
= control target key start
LH: loop header
LB: loop body
LE: loop exit
PB: predicated region body
PF: predicated region fallthrough
CT: control target
= control target key end

     0   :  { %s141_s0 = inlined_call_operand.vmem [shape: f32[8,16], index: 0, kind: input, shape index: {}]   ;;  %s142_s1 = inlined_call_operand.vmem [shape: f32[1,16], index: 1, kind: input, shape index: {}]   ;;  %s143_s2 = inlined_call_operand.vmem [shape: s32[8,1], index: 2, kind: input, shape index: {}]   ;;  %s144_s3 = inlined_call_operand.hbm [shape: f32[1,1], index: 3, kind: output, shape index: {}]  }
   0x1   :  { %v22_v0 = vld [vmem:[%s143_s2] sm:$0xff] }
   0x2   :  { %8 = vsyncpa [#allocation4], 0  ;;  %v103_v1 = vmov 0   ;;  %vm19_vm0 = vcmask 122880   ;;  %v104_v2 = vmov 0.0   ;;  %v23_v3 = vlaneseq  ;;  %v21_v5 = vld [vmem:[%s141_s0] sm:$0xff] }
   0x3   :  { %88 = vset.pattern.permute.xlu0 %v103_v1  ;;  %20 = vst.msk [vmem:[#allocation2] sm:$0x1] %vm19_vm0, %v104_v2  ;;  %vm38_vm1 = vcmask 130048   ;;  %v53_v17 = vld [vmem:[%s142_s1] sm:$0x1]  ;;  %s73_s18 = sshll.u32 %s144_s3, 4  ;;  %s74_s18 = int_to_ptr.hbm [resolvable:$true] %s73_s18 }
   0x4   :  { %28 = vperm.xlu0 %88, %v22_v0   ;;  %v24_v4 = vand.u32 127, %v23_v3  ;;  %s105_s20 = smov [#allocation3]  }
   0xa   :  { %v37_v14 = vld [vmem:[#allocation2] sm:$0x1] }
  0x76   :  { %v29_v6 = vpop.permute.xlu0 %28 }
  0x77   :  { %vm30_vm2 = vcmp.eq.s32.totalorder %v24_v4, %v29_v6 }
  0x78   :  { %v36_v7 = vsel %vm30_vm2, %v21_v5, 0.0 }
  0x79   :  { %v39_v8 = vsel %vm38_vm1, %v36_v7, 0.0 }
  0x7a   :  { %v40_v9 = vrot.slane %v39_v8, 4 }
  0x7c   :  { %v41_v10 = vadd.f32 %v40_v9, %v39_v8 }
  0x7e   :  { %v42_v11 = vrot.slane %v41_v10, 2 }
  0x80   :  { %v43_v12 = vadd.f32 %v42_v11, %v41_v10 }
  0x82   :  { %v44_v13 = vrot.slane %v43_v12, 1 }
  0x84   :  { %v45_v15 = vadd.f32 %v44_v13, %v43_v12 }
  0x86   :  { %v46_v16 = vadd.f32 %v45_v15, %v37_v14 }
  0x88   :  { %48 = vst.msk [vmem:[#allocation2] sm:$0x1] %vm19_vm0, %v46_v16 }
  0x8f   :  { %v52_v18 = vld [vmem:[#allocation2] sm:$0x1] }
  0x90   :  { %v54_v19 = vmul.f32 %v53_v17, %v52_v18 }
  0x92   :  { %v55_v20 = vsel %vm19_vm0, %v54_v19, 0.0 }
  0x93   :  { %56 = vadd.xlane.f32.xlu0 %v55_v20 }
 0x106   :  { %v57_v21 = vpop.xlane.xlu0 %56 }
 0x107   :  { %v58_v22 = vrot.slane %v57_v21, 4 }
 0x109   :  { %v59_v23 = vadd.f32 %v58_v22, %v57_v21 }
 0x10b   :  { %v60_v24 = vrot.slane %v59_v23, 2 }
 0x10d   :  { %v61_v25 = vadd.f32 %v60_v24, %v59_v23 }
 0x10f   :  { %v62_v26 = vrot.slane %v61_v25, 1 }
 0x111   :  { %v63_v27 = vadd.f32 %v62_v26, %v61_v25 }
 0x113   :  { %83 = vpush %v63_v27 }
 0x144   :  { %s84_s19 = spop %83 }
 0x145   :  { %s65_s1 = ssub.f32 0.0, %s84_s19 }
 0x147   :  { %67 = sst [smem:[#allocation3]] %s65_s1 }
 0x148   :  { %76 = dma.smem_to_hbm %s105_s20, 16, %s74_s18, [#allocation4]  }
 0x149   :  { %101 = dma.done.wait [#allocation4], 16  }
 0x14a   :  { %102 = vsyncadd [#allocation4], 4294967280 }
 0x14b   :  { %81 = sfence }
 0x14c   :  { %82 = vsyncpa [#allocation4], 1 }

</bundles_post_ra>
